<compile_context>
chip_gen: v5e
topology: v5e:2x2
jax: 0.10.0
libtpu: 0.0.40
codegen_flags: <defaults>
</compile_context>

<pallas_src>
import functools

import jax
import jax.numpy as jnp
from jax.experimental import pallas as pl
from jax.experimental.pallas import tpu as pltpu

# ---- model dimensions (small, consistent with a BERT-like token tagger) ----
B, S  = 2, 8          # batch, sequence length
N     = B * S         # flattened token count
V     = 64            # vocab size
H     = 128           # hidden / feature dim (config.dimension of base model)
C     = 8             # config.dimension_out  (number of tag classes)
D_IDX = 16            # config.index_dimension
E     = 64            # epinet hidden width

E_TOT = 128           # combined embedding rows ([word;type;pos] = 74, zero-padded)
HC    = 256           # fused hidden width ([tanh H=128 | relu E=64] = 192, zero-padded)
OUT_W = 128           # lane-dense output slab width (logits in [0,C), loss in col C)

# Token tile = all tokens -> single grid step at this size.  If N scales up,
# set TN to a multiple of 128 (v5e MXU) or 256 (v6e / v7x MXU).
TN    = N


def _token_enn_kernel(ids_ref, tt_ref, emb_ref, w1_ref, b1_ref,
                      w2_ref, b2_ref, onehot_ref, mask_ref, out_ref):
    n = ids_ref.shape[0]                                              # TN

    # ---- fused embedding lookup: one-hot(ids / type / pos) @ [word;type;pos] ----
    col_e = jax.lax.broadcasted_iota(jnp.int32, (n, E_TOT), 1)
    row   = jax.lax.broadcasted_iota(jnp.int32, (n, 1), 0)
    pos   = row % S                                   # position id of each flat token
    oh = ((col_e == ids_ref[...]) |
          (col_e == V + tt_ref[...]) |
          (col_e == (V + 2) + pos)).astype(jnp.float32)               # (n, E_TOT)
    x = jnp.dot(oh, emb_ref[...], preferred_element_type=jnp.float32)  # (n, H)

    # ---- fused base + epinet hidden matmul:  x @ [w1 | we1_x | 0-pad] ----
    hcat = jnp.dot(x, w1_ref[...], preferred_element_type=jnp.float32) + b1_ref[...]
    col_h = jax.lax.broadcasted_iota(jnp.int32, (n, HC), 1)
    act = jnp.where(col_h < H, jnp.tanh(hcat), jnp.maximum(hcat, 0.0))  # tanh | relu

    # ---- fused output matmul, already a lane-dense 128-wide slab ----
    # cols [0, C) hold base + epinet logits; cols [C, 128) are exactly zero.
    logits_wide = (jnp.dot(act, w2_ref[...], preferred_element_type=jnp.float32)
                   + b2_ref[...])                                      # (n, OUT_W)

    # ---- masked token-level softmax cross-entropy (stable, lane-masked) ----
    col_o = jax.lax.broadcasted_iota(jnp.int32, (n, OUT_W), 1)
    logits_m = jnp.where(col_o < C, logits_wide, jnp.float32(-1e30))
    m = jnp.max(logits_m, axis=-1, keepdims=True)
    lse = m + jnp.log(jnp.sum(jnp.exp(logits_m - m), axis=-1, keepdims=True))
    tgt_logit = jnp.sum(onehot_ref[...] * logits_wide, axis=-1, keepdims=True)
    loss_tok = (lse - tgt_logit) * mask_ref[...]                       # (n, 1)

    # ---- pack: logits in cols [0, C), per-token masked loss in col C ----
    out_ref[...] = logits_wide + jnp.where(col_o == C, loss_tok, 0.0)


def init_params(key):
    ks = jax.random.split(key, 8)
    sc = 0.02
    return {
        "word_emb": sc * jax.random.normal(ks[0], (V, H), jnp.float32),
        "type_emb": sc * jax.random.normal(ks[1], (2, H), jnp.float32),
        "pos_emb":  sc * jax.random.normal(ks[2], (S, H), jnp.float32),
        "w1":  sc * jax.random.normal(ks[3], (H, H), jnp.float32),
        "b1":  jnp.zeros((H,), jnp.float32),
        "w2":  sc * jax.random.normal(ks[4], (H, C), jnp.float32),
        "b2":  jnp.zeros((C,), jnp.float32),
        "we1_x": sc * jax.random.normal(ks[5], (H, E), jnp.float32),
        "we1_z": sc * jax.random.normal(ks[6], (D_IDX, E), jnp.float32),
        "be1": jnp.zeros((E,), jnp.float32),
        "we2": sc * jax.random.normal(ks[7], (E, D_IDX, C), jnp.float32),
    }


@functools.partial(jax.jit, static_argnames=("only_bert",))
def token_enn_forward(params, ids, mask, token_type_ids, target_pos,
                      target_tag, z, only_bert=False):
    # TODO(synk): target_pos is consumed by the (unspecified) base model in the
    # original code; it is unused in this synthetic forward.
    del target_pos
    n_tok = ids.size
    assert n_tok % TN == 0

    ids_2d = ids.reshape(n_tok, 1).astype(jnp.int32)
    tt_2d  = token_type_ids.reshape(n_tok, 1).astype(jnp.int32)
    mask_f = mask.reshape(n_tok, 1).astype(jnp.float32)
    onehot = jax.nn.one_hot(target_tag.reshape(-1), OUT_W, dtype=jnp.float32)

    # ---- fold the epistemic index z into the epinet params (z fixed per call) ----
    be1_eff = params["be1"] + z @ params["we1_z"]                  # (E,)
    we2z    = jnp.einsum("d,edc->ec", z, params["we2"])            # (E, C)
    if only_bert:
        we2z = jnp.zeros_like(we2z)      # base-model-only logits / loss

    # ---- parameter packing (param-sized, fused by XLA; no (N,H) HBM traffic) ----
    emb_cat = jnp.zeros((E_TOT, H), jnp.float32)
    emb_cat = emb_cat.at[:V].set(params["word_emb"])
    emb_cat = emb_cat.at[V:V + 2].set(params["type_emb"])
    emb_cat = emb_cat.at[V + 2:V + 2 + S].set(params["pos_emb"])

    w_cat1 = jnp.zeros((H, HC), jnp.float32)
    w_cat1 = w_cat1.at[:, :H].set(params["w1"])
    w_cat1 = w_cat1.at[:, H:H + E].set(params["we1_x"])
    b_cat1 = jnp.zeros((1, HC), jnp.float32)
    b_cat1 = b_cat1.at[0, :H].set(params["b1"])
    b_cat1 = b_cat1.at[0, H:H + E].set(be1_eff)

    w_cat2 = jnp.zeros((HC, OUT_W), jnp.float32)
    w_cat2 = w_cat2.at[:H, :C].set(params["w2"])
    w_cat2 = w_cat2.at[H:H + E, :C].set(we2z)
    b_cat2 = jnp.zeros((1, OUT_W), jnp.float32).at[0, :C].set(params["b2"])

    # TODO(synk): at realistic model sizes, cast the packed weights to bf16 here
    # (keep preferred_element_type=f32) to halve weight HBM traffic on v6e/v7x.

    full = lambda shape: pl.BlockSpec(shape, lambda i, s=len(shape): (0,) * s)

    out_slab = pl.pallas_call(
        _token_enn_kernel,
        out_shape=jax.ShapeDtypeStruct((n_tok, OUT_W), jnp.float32),
        grid_spec=pltpu.PrefetchScalarGridSpec(
            num_scalar_prefetch=0,
            grid=(n_tok // TN,),                      # == (1,) at this size
            in_specs=[
                pl.BlockSpec((TN, 1), lambda i: (i, 0)),       # ids
                pl.BlockSpec((TN, 1), lambda i: (i, 0)),       # token_type_ids
                full((E_TOT, H)),                              # [word;type;pos] embeddings
                full((H, HC)), full((1, HC)),                  # [w1|we1_x], [b1|be1_eff]
                full((HC, OUT_W)), full((1, OUT_W)),           # [[w2];[we2z]] pad, b2 pad
                pl.BlockSpec((TN, OUT_W), lambda i: (i, 0)),   # one-hot targets (128 wide)
                pl.BlockSpec((TN, 1), lambda i: (i, 0)),       # mask
            ],
            out_specs=pl.BlockSpec((TN, OUT_W), lambda i: (i, 0)),
        ),
        compiler_params=pltpu.CompilerParams(
            dimension_semantics=("parallel",)),
    )(ids_2d, tt_2d, emb_cat, w_cat1, b_cat1, w_cat2, b_cat2, onehot, mask_f)

    logits   = out_slab[:, :C]
    loss_tok = out_slab[:, C]
    tag  = jnp.argmax(logits, axis=-1).reshape(ids.shape)
    loss = jnp.sum(loss_tok) / jnp.maximum(jnp.sum(mask_f), 1.0)
    return tag, loss


if __name__ == "__main__":
    key = jax.random.PRNGKey(0)
    kp, ki, km, kt, kz = jax.random.split(key, 5)

    params = init_params(kp)

    ids = jax.random.randint(ki, (B, S), 0, V, dtype=jnp.int32)
    # attention mask: first 6 tokens of each sequence are real
    mask = (jnp.arange(S)[None, :] < 6).astype(jnp.int32) * jnp.ones((B, 1), jnp.int32)
    token_type_ids = jnp.zeros((B, S), jnp.int32)
    target_pos = jnp.zeros((B, S), jnp.int32)
    target_tag = jax.random.randint(kt, (B, S), 0, C, dtype=jnp.int32)
    z = jax.random.normal(kz, (D_IDX,), jnp.float32)   # epistemic index sample

    tag, loss = token_enn_forward(params, ids, mask, token_type_ids,
                                  target_pos, target_tag, z)
    tag_b, loss_b = token_enn_forward(params, ids, mask, token_type_ids,
                                      target_pos, target_tag, z, only_bert=True)
    jax.block_until_ready((tag, loss, tag_b, loss_b))
    assert tag.shape == (B, S) and loss.shape == ()
    assert tag_b.shape == (B, S) and loss_b.shape == ()
    assert bool(jnp.isfinite(loss)) and bool(jnp.isfinite(loss_b))
    print("KERNEL_OK")
</pallas_src>

<mosaic_0001>
module attributes {stable_mosaic.version = 11 : i64} {
  func.func @_token_enn_kernel(%arg0: i32, %arg1: memref<16x1xi32, #tpu.memory_space<vmem>>, %arg2: memref<16x1xi32, #tpu.memory_space<vmem>>, %arg3: memref<128x128xf32, #tpu.memory_space<vmem>>, %arg4: memref<128x256xf32, #tpu.memory_space<vmem>>, %arg5: memref<1x256xf32, #tpu.memory_space<vmem>>, %arg6: memref<256x128xf32, #tpu.memory_space<vmem>>, %arg7: memref<1x128xf32, #tpu.memory_space<vmem>>, %arg8: memref<16x128xf32, #tpu.memory_space<vmem>>, %arg9: memref<16x1xf32, #tpu.memory_space<vmem>>, %arg10: memref<16x128xf32, #tpu.memory_space<vmem>>) attributes {dimension_semantics = [#tpu.dimension_semantics<parallel>], iteration_bounds = array<i64: 1>, scalar_prefetch = 0 : i64, scratch_operands = 0 : i64, tpu.core_type = #tpu.core_type<tc>, window_params = [{transform_indices = @transform_0, window_bounds = array<i64: 16, 1>}, {transform_indices = @transform_1, window_bounds = array<i64: 16, 1>}, {pipeline_mode = #tpu.pipeline_mode<synchronous>, transform_indices = @transform_2, window_bounds = array<i64: 128, 128>}, {pipeline_mode = #tpu.pipeline_mode<synchronous>, transform_indices = @transform_3, window_bounds = array<i64: 128, 256>}, {pipeline_mode = #tpu.pipeline_mode<synchronous>, transform_indices = @transform_4, window_bounds = array<i64: 1, 256>}, {pipeline_mode = #tpu.pipeline_mode<synchronous>, transform_indices = @transform_5, window_bounds = array<i64: 256, 128>}, {pipeline_mode = #tpu.pipeline_mode<synchronous>, transform_indices = @transform_6, window_bounds = array<i64: 1, 128>}, {transform_indices = @transform_7, window_bounds = array<i64: 16, 128>}, {transform_indices = @transform_8, window_bounds = array<i64: 16, 1>}, {transform_indices = @transform_9, window_bounds = array<i64: 16, 128>}]} {
    %0 = tpu.iota {dimensions = array<i32: 1>} : vector<16x128xi32>
    %1 = tpu.iota {dimensions = array<i32: 0>} : vector<16x1xi32>
    %c8_i32 = arith.constant 8 : i32
    %c0_i32 = arith.constant 0 : i32
    %2 = arith.cmpi eq, %c8_i32, %c0_i32 : i32
    %c1_i32 = arith.constant 1 : i32
    %3 = arith.select %2, %c1_i32, %c8_i32 : i32
    %4 = vector.broadcast %3 : i32 to vector<16x1xi32>
    %5 = arith.remsi %1, %4 : vector<16x1xi32>
    %c0_i32_0 = arith.constant 0 : i32
    %6 = vector.broadcast %c0_i32_0 : i32 to vector<16x1xi32>
    %7 = arith.cmpi ne, %5, %6 : vector<16x1xi32>
    %c0_i32_1 = arith.constant 0 : i32
    %8 = vector.broadcast %c0_i32_1 : i32 to vector<16x1xi32>
    %9 = arith.cmpi slt, %5, %8 : vector<16x1xi32>
    %c0_i32_2 = arith.constant 0 : i32
    %10 = arith.cmpi slt, %3, %c0_i32_2 : i32
    %11 = vector.broadcast %10 : i1 to vector<16x1xi1>
    %12 = vector.broadcast %11 : vector<16x1xi1> to vector<16x1xi1>
    %13 = arith.xori %9, %12 : vector<16x1xi1>
    %14 = arith.andi %13, %7 : vector<16x1xi1>
    %15 = vector.broadcast %3 : i32 to vector<16x1xi32>
    %16 = arith.addi %5, %15 : vector<16x1xi32>
    %17 = arith.select %14, %16, %5 : vector<16x1xi1>, vector<16x1xi32>
    %c0 = arith.constant 0 : index
    %c0_3 = arith.constant 0 : index
    %18 = vector.load %arg1[%c0, %c0_3] : memref<16x1xi32, #tpu.memory_space<vmem>>, vector<16x1xi32>
    %19 = vector.broadcast %18 : vector<16x1xi32> to vector<16x128xi32>
    %20 = arith.cmpi eq, %0, %19 : vector<16x128xi32>
    %c0_4 = arith.constant 0 : index
    %c0_5 = arith.constant 0 : index
    %21 = vector.load %arg2[%c0_4, %c0_5] : memref<16x1xi32, #tpu.memory_space<vmem>>, vector<16x1xi32>
    %c64_i32 = arith.constant 64 : i32
    %22 = vector.broadcast %c64_i32 : i32 to vector<16x1xi32>
    %23 = arith.addi %22, %21 : vector<16x1xi32>
    %24 = vector.broadcast %23 : vector<16x1xi32> to vector<16x128xi32>
    %25 = arith.cmpi eq, %0, %24 : vector<16x128xi32>
    %26 = arith.ori %20, %25 : vector<16x128xi1>
    %c66_i32 = arith.constant 66 : i32
    %27 = vector.broadcast %c66_i32 : i32 to vector<16x1xi32>
    %28 = arith.addi %27, %17 : vector<16x1xi32>
    %29 = vector.broadcast %28 : vector<16x1xi32> to vector<16x128xi32>
    %30 = arith.cmpi eq, %0, %29 : vector<16x128xi32>
    %31 = arith.ori %26, %30 : vector<16x128xi1>
    %32 = arith.extui %31 : vector<16x128xi1> to vector<16x128xi32>
    %33 = arith.sitofp %32 : vector<16x128xi32> to vector<16x128xf32>
    %c0_6 = arith.constant 0 : index
    %c0_7 = arith.constant 0 : index
    %34 = vector.load %arg3[%c0_6, %c0_7] : memref<128x128xf32, #tpu.memory_space<vmem>>, vector<128x128xf32>
    %cst = arith.constant dense<0.000000e+00> : vector<16x128xf32>
    %35 = tpu.matmul %33, %34, %cst {dimension_numbers = #tpu.dot_dimension_numbers<[1], [0], [0], [1], [0, 0, 1, 1], [], []>} : vector<16x128xf32>, vector<128x128xf32>, vector<16x128xf32> -> vector<16x128xf32>
    %c0_8 = arith.constant 0 : index
    %c0_9 = arith.constant 0 : index
    %36 = vector.load %arg4[%c0_8, %c0_9] : memref<128x256xf32, #tpu.memory_space<vmem>>, vector<128x256xf32>
    %cst_10 = arith.constant dense<0.000000e+00> : vector<16x256xf32>
    %37 = tpu.matmul %35, %36, %cst_10 {dimension_numbers = #tpu.dot_dimension_numbers<[1], [0], [0], [1], [0, 0, 1, 1], [], []>} : vector<16x128xf32>, vector<128x256xf32>, vector<16x256xf32> -> vector<16x256xf32>
    %c0_11 = arith.constant 0 : index
    %c0_12 = arith.constant 0 : index
    %38 = vector.load %arg5[%c0_11, %c0_12] : memref<1x256xf32, #tpu.memory_space<vmem>>, vector<1x256xf32>
    %39 = vector.broadcast %38 : vector<1x256xf32> to vector<16x256xf32>
    %40 = arith.addf %37, %39 : vector<16x256xf32>
    %41 = tpu.iota {dimensions = array<i32: 1>} : vector<16x256xi32>
    %c128_i32 = arith.constant 128 : i32
    %42 = vector.broadcast %c128_i32 : i32 to vector<16x256xi32>
    %43 = arith.cmpi slt, %41, %42 : vector<16x256xi32>
    %44 = math.tanh %40 : vector<16x256xf32>
    %cst_13 = arith.constant 0.000000e+00 : f32
    %45 = vector.broadcast %cst_13 : f32 to vector<16x256xf32>
    %46 = arith.maximumf %40, %45 : vector<16x256xf32>
    %47 = arith.select %43, %44, %46 : vector<16x256xi1>, vector<16x256xf32>
    %c0_14 = arith.constant 0 : index
    %c0_15 = arith.constant 0 : index
    %48 = vector.load %arg6[%c0_14, %c0_15] : memref<256x128xf32, #tpu.memory_space<vmem>>, vector<256x128xf32>
    %cst_16 = arith.constant dense<0.000000e+00> : vector<16x128xf32>
    %49 = tpu.matmul %47, %48, %cst_16 {dimension_numbers = #tpu.dot_dimension_numbers<[1], [0], [0], [1], [0, 0, 1, 1], [], []>} : vector<16x256xf32>, vector<256x128xf32>, vector<16x128xf32> -> vector<16x128xf32>
    %c0_17 = arith.constant 0 : index
    %c0_18 = arith.constant 0 : index
    %50 = vector.load %arg7[%c0_17, %c0_18] : memref<1x128xf32, #tpu.memory_space<vmem>>, vector<1x128xf32>
    %51 = vector.broadcast %50 : vector<1x128xf32> to vector<16x128xf32>
    %52 = arith.addf %49, %51 : vector<16x128xf32>
    %53 = tpu.iota {dimensions = array<i32: 1>} : vector<16x128xi32>
    %c8_i32_19 = arith.constant 8 : i32
    %54 = vector.broadcast %c8_i32_19 : i32 to vector<16x128xi32>
    %55 = arith.cmpi slt, %53, %54 : vector<16x128xi32>
    %cst_20 = arith.constant -1.000000e+30 : f32
    %56 = vector.broadcast %cst_20 : f32 to vector<16x128xf32>
    %57 = arith.select %55, %52, %56 : vector<16x128xi1>, vector<16x128xf32>
    %cst_21 = arith.constant dense<0xFF800000> : vector<16xf32>
    %58 = vector.multi_reduction <maximumf>, %57, %cst_21 [1] : vector<16x128xf32> to vector<16xf32>
    %59 = vector.shape_cast %58 : vector<16xf32> to vector<16x1xf32>
    %60 = vector.broadcast %59 : vector<16x1xf32> to vector<16x128xf32>
    %61 = arith.subf %57, %60 : vector<16x128xf32>
    %62 = math.exp %61 : vector<16x128xf32>
    %cst_22 = arith.constant dense<0.000000e+00> : vector<16xf32>
    %63 = vector.multi_reduction <add>, %62, %cst_22 [1] : vector<16x128xf32> to vector<16xf32>
    %64 = vector.shape_cast %63 : vector<16xf32> to vector<16x1xf32>
    %65 = math.log %64 : vector<16x1xf32>
    %66 = arith.addf %59, %65 : vector<16x1xf32>
    %c0_23 = arith.constant 0 : index
    %c0_24 = arith.constant 0 : index
    %67 = vector.load %arg8[%c0_23, %c0_24] : memref<16x128xf32, #tpu.memory_space<vmem>>, vector<16x128xf32>
    %68 = arith.mulf %67, %52 : vector<16x128xf32>
    %cst_25 = arith.constant dense<0.000000e+00> : vector<16xf32>
    %69 = vector.multi_reduction <add>, %68, %cst_25 [1] : vector<16x128xf32> to vector<16xf32>
    %70 = vector.shape_cast %69 : vector<16xf32> to vector<16x1xf32>
    %71 = arith.subf %66, %70 : vector<16x1xf32>
    %c0_26 = arith.constant 0 : index
    %c0_27 = arith.constant 0 : index
    %72 = vector.load %arg9[%c0_26, %c0_27] : memref<16x1xf32, #tpu.memory_space<vmem>>, vector<16x1xf32>
    %73 = arith.mulf %71, %72 : vector<16x1xf32>
    %c8_i32_28 = arith.constant 8 : i32
    %74 = vector.broadcast %c8_i32_28 : i32 to vector<16x128xi32>
    %75 = arith.cmpi eq, %53, %74 : vector<16x128xi32>
    %cst_29 = arith.constant 0.000000e+00 : f32
    %76 = vector.shape_cast %73 : vector<16x1xf32> to vector<16x1xf32>
    %77 = vector.broadcast %76 : vector<16x1xf32> to vector<16x128xf32>
    %78 = vector.broadcast %cst_29 : f32 to vector<16x128xf32>
    %79 = arith.select %75, %77, %78 : vector<16x128xi1>, vector<16x128xf32>
    %80 = arith.addf %52, %79 : vector<16x128xf32>
    %c0_30 = arith.constant 0 : index
    %c0_31 = arith.constant 0 : index
    %81 = vector.load %arg10[%c0_30, %c0_31] : memref<16x128xf32, #tpu.memory_space<vmem>>, vector<16x128xf32>
    tpu.vector_store %arg10[%c0_30, %c0_31], %80 {strides = array<i32>} : memref<16x128xf32, #tpu.memory_space<vmem>>, vector<16x128xf32>,
    return
  }
  func.func @transform_0(%arg0: i32) -> (i32, i32) {
    %c0_i32 = arith.constant 0 : i32
    %c0_i32_0 = arith.constant 0 : i32
    return %arg0, %c0_i32 : i32, i32
  }
  func.func @transform_1(%arg0: i32) -> (i32, i32) {
    %c0_i32 = arith.constant 0 : i32
    %c0_i32_0 = arith.constant 0 : i32
    return %arg0, %c0_i32 : i32, i32
  }
  func.func @transform_2(%arg0: i32) -> (i32, i32) {
    %c0_i32 = arith.constant 0 : i32
    %c0_i32_0 = arith.constant 0 : i32
    %c0_i32_1 = arith.constant 0 : i32
    return %c0_i32, %c0_i32_0 : i32, i32
  }
  func.func @transform_3(%arg0: i32) -> (i32, i32) {
    %c0_i32 = arith.constant 0 : i32
    %c0_i32_0 = arith.constant 0 : i32
    %c0_i32_1 = arith.constant 0 : i32
    return %c0_i32, %c0_i32_0 : i32, i32
  }
  func.func @transform_4(%arg0: i32) -> (i32, i32) {
    %c0_i32 = arith.constant 0 : i32
    %c0_i32_0 = arith.constant 0 : i32
    %c0_i32_1 = arith.constant 0 : i32
    return %c0_i32, %c0_i32_0 : i32, i32
  }
  func.func @transform_5(%arg0: i32) -> (i32, i32) {
    %c0_i32 = arith.constant 0 : i32
    %c0_i32_0 = arith.constant 0 : i32
    %c0_i32_1 = arith.constant 0 : i32
    return %c0_i32, %c0_i32_0 : i32, i32
  }
  func.func @transform_6(%arg0: i32) -> (i32, i32) {
    %c0_i32 = arith.constant 0 : i32
    %c0_i32_0 = arith.constant 0 : i32
    %c0_i32_1 = arith.constant 0 : i32
    return %c0_i32, %c0_i32_0 : i32, i32
  }
  func.func @transform_7(%arg0: i32) -> (i32, i32) {
    %c0_i32 = arith.constant 0 : i32
    %c0_i32_0 = arith.constant 0 : i32
    return %arg0, %c0_i32 : i32, i32
  }
  func.func @transform_8(%arg0: i32) -> (i32, i32) {
    %c0_i32 = arith.constant 0 : i32
    %c0_i32_0 = arith.constant 0 : i32
    return %arg0, %c0_i32 : i32, i32
  }
  func.func @transform_9(%arg0: i32) -> (i32, i32) {
    %c0_i32 = arith.constant 0 : i32
    %c0_i32_0 = arith.constant 0 : i32
    return %arg0, %c0_i32 : i32, i32
  }
}

</mosaic_0001>

<bundles_post_ra>
// kernel: eq.1
= control target key start
LH: loop header
LB: loop body
LE: loop exit
PB: predicated region body
PF: predicated region fallthrough
CT: control target
= control target key end

     0   :  { %vm7_vm0 = vcmask 64512   ;;  %vm13_vm1 = vcmask 130112   ;;  %s39_s0 = inlined_call_operand.vmem [shape: s32[2,8], index: 0, kind: input, shape index: {}]   ;;  %s40_s1 = inlined_call_operand.vmem [shape: s32[16], index: 1, kind: output, shape index: {}]  }
   0x1   :  { %v4_v0 = vld [vmem:[%s39_s0] sm:$0x3]  ;;  %s22_s0 = smov 8  }
   0x2   :  { %5 = vst [vmem:[#allocation1] sm:$0x3] %v4_v0 }
   0x9   :  { %v10_v1 = vld [vmem:[#allocation1 + $0x1] sm:$0x1]   ;;  %v6_v2 = vld [vmem:[#allocation1] sm:$0x1]  }
   0xa   :  { %11 = vrot.lane.b32.xlu0 %v10_v1, %s22_s0  ;;  %8 = vst.msk [vmem:[#allocation0] sm:$0x1] %vm7_vm0, %v6_v2  }
  0x7c   :  { %v12_v3 = vpop.permute.xlu0 %11  }
  0x7d   :  { %14 = vst.msk [vmem:[#allocation0] sm:$0x1] %vm13_vm1, %v12_v3  }
  0x84   :  { %v17_v4 = vld [vmem:[#allocation0] sm:$0x1] }
  0x85   :  { %20 = vst [vmem:[%s40_s1] sm:$0x1] %v17_v4 }

// kernel: token_enn_forward.1
= control target key start
LH: loop header
LB: loop body
LE: loop exit
PB: predicated region body
PF: predicated region fallthrough
CT: control target
= control target key end

     0   :  { %v411_v0 = vmov 0   ;;  %v32_v33 = vlaneseq  ;;  %v412_v60 = vmov 1.0   ;;  %s749_s0 = inlined_call_operand.vmem [shape: s32[16,1], index: 0, kind: input, shape index: {}]   ;;  %s750_s1 = inlined_call_operand.vmem [shape: s32[16,1], index: 1, kind: input, shape index: {}]   ;;  %s751_s2 = inlined_call_operand.vmem [shape: f32[128,128], index: 2, kind: input, shape index: {}]   ;;  %s752_s3 = inlined_call_operand.vmem [shape: f32[128,256], index: 3, kind: input, shape index: {}]   ;;  %s753_s5 = inlined_call_operand.vmem [shape: f32[256,128], index: 5, kind: input, shape index: {}]   ;;  %s754_s4 = inlined_call_operand.vmem [shape: f32[1,256], index: 4, kind: input, shape index: {}]   ;;  %s755_s6 = inlined_call_operand.vmem [shape: f32[1,128], index: 6, kind: input, shape index: {}]   ;;  %s756_s7 = inlined_call_operand.vmem [shape: f32[16,128], index: 7, kind: input, shape index: {}]   ;;  %s757_s8 = inlined_call_operand.vmem [shape: f32[16,1], index: 8, kind: input, shape index: {}]   ;;  %s758_s9 = inlined_call_operand.vmem [shape: f32[16,128], index: 9, kind: output, shape index: {}]  }
   0x1   :  { %396 = vset.pattern.permute.xlu1 %v411_v0  ;;  %395 = vset.pattern.permute.xlu0 %v411_v0  ;;  %v62_v1 = vld [vmem:[%s749_s0 + $0x8] sm:$0xff]  ;;  %v61_v2 = vld [vmem:[%s749_s0] sm:$0xff]  ;;  %v110_v3 = vld [vmem:[%s751_s2 + $0x78] sm:$0xff] }
   0x2   :  { %67 = vperm.xlu1 %396, %v62_v1   ;;  %64 = vperm.xlu0 %395, %v61_v2   ;;  %v109_v4 = vld [vmem:[%s751_s2 + $0x70] sm:$0xff]  ;;  %v72_v5 = vld [vmem:[%s750_s1 + $0x8] sm:$0xff]  ;;  %v71_v6 = vld [vmem:[%s750_s1] sm:$0xff]  ;;  %v35_v36 = vshrl.u32 %v32_v33, 7  ;;  %v583_v50 = vand.u32 127, %v32_v33 }
   0x3   :  { %111 = vmatpush.msra.mxu0 %v110_v3  ;;  %397 = vset.pattern.permute.xlu2 %v411_v0  ;;  %v108_v7 = vld [vmem:[%s751_s2 + $0x68] sm:$0xff]  ;;  %v74_v8 = vadd.s32 64, %v72_v5  ;;  %v73_v9 = vadd.s32 64, %v71_v6  ;;  %v107_v10 = vld [vmem:[%s751_s2 + $0x60] sm:$0xff]  ;;  %v106_v11 = vld [vmem:[%s751_s2 + $0x58] sm:$0xff] }
   0x4   :  { %v105_v12 = vld [vmem:[%s751_s2 + $0x50] sm:$0xff]  ;;  %v104_v13 = vld [vmem:[%s751_s2 + $0x48] sm:$0xff]  ;;  %v103_v14 = vld [vmem:[%s751_s2 + $0x40] sm:$0xff]  ;;  %v41_v41 = vand.u32 7, %v35_v36  ;;  %v36_v47 = vadd.s32 8, %v35_v36  ;;  %vm315_vm10 = vcmp.lt.s32.totalorder %v583_v50, 8 }
   0x5   :  { %112 = vmatpush.msra.mxu0 %v109_v4  ;;  %v102_v15 = vld [vmem:[%s751_s2 + $0x38] sm:$0xff]  ;;  %v101_v16 = vld [vmem:[%s751_s2 + $0x30] sm:$0xff]  ;;  %v100_v17 = vld [vmem:[%s751_s2 + $0x28] sm:$0xff]  ;;  %vm352_vm11 = vcmp.eq.s32.totalorder %v583_v50, 8 }
   0x6   :  { %v99_v18 = vld [vmem:[%s751_s2 + $0x20] sm:$0xff]  ;;  %v98_v19 = vld [vmem:[%s751_s2 + $0x18] sm:$0xff]  ;;  %v97_v20 = vld [vmem:[%s751_s2 + $0x10] sm:$0xff]  ;;  %v85_v46 = vadd.s32 66, %v41_v41  ;;  %v48_v54 = vand.u32 7, %v36_v47 }
   0x7   :  { %113 = vmatpush.msra.mxu0 %v108_v7  ;;  %v96_v21 = vld [vmem:[%s751_s2 + $0x8] sm:$0xff]  ;;  %v95_v22 = vld [vmem:[%s751_s2] sm:$0xff]  ;;  %v164_v23 = vld [vmem:[%s752_s3 + $0xf0] sm:$0xff] }
   0x8   :  { %v165_v24 = vld [vmem:[%s752_s3 + $0xf8] sm:$0xff]  ;;  %v162_v25 = vld [vmem:[%s752_s3 + $0xe0] sm:$0xff]  ;;  %172 = vmatpush.msra.mxu1 %v164_v23  ;;  %v163_v26 = vld [vmem:[%s752_s3 + $0xe8] sm:$0xff]  ;;  %vm87_vm1 = vcmp.eq.s32.totalorder %v583_v50, %v85_v46  ;;  %v86_v61 = vadd.s32 66, %v48_v54 }
   0x9   :  { %114 = vmatpush.msra.mxu0 %v107_v10  ;;  %195 = vmatpush.msra.mxu2 %v165_v24  ;;  %v160_v27 = vld [vmem:[%s752_s3 + $0xd0] sm:$0xff]  ;;  %v161_v28 = vld [vmem:[%s752_s3 + $0xd8] sm:$0xff]  ;;  %v158_v29 = vld [vmem:[%s752_s3 + $0xc0] sm:$0xff] }
   0xa   :  { %79 = vperm.xlu1 %396, %v74_v8   ;;  %76 = vperm.xlu0 %395, %v73_v9   ;;  %v159_v30 = vld [vmem:[%s752_s3 + $0xc8] sm:$0xff]  ;;  %v156_v31 = vld [vmem:[%s752_s3 + $0xb0] sm:$0xff]  ;;  %v157_v32 = vld [vmem:[%s752_s3 + $0xb8] sm:$0xff]  ;;  %vm88_vm8 = vcmp.eq.s32.totalorder %v583_v50, %v86_v61 }
   0xb   :  { %115 = vmatpush.msra.mxu0 %v106_v11  ;;  %173 = vmatpush.msra.mxu1 %v162_v25  ;;  %v154_v34 = vld [vmem:[%s752_s3 + $0xa0] sm:$0xff]  ;;  %v155_v35 = vld [vmem:[%s752_s3 + $0xa8] sm:$0xff]  ;;  %v152_v37 = vld [vmem:[%s752_s3 + $0x90] sm:$0xff] }
   0xc   :  { %196 = vmatpush.msra.mxu2 %v163_v26  ;;  %v153_v38 = vld [vmem:[%s752_s3 + $0x98] sm:$0xff]  ;;  %v150_v42 = vld [vmem:[%s752_s3 + $0x80] sm:$0xff]  ;;  %v151_v43 = vld [vmem:[%s752_s3 + $0x88] sm:$0xff] }
   0xd   :  { %116 = vmatpush.msra.mxu0 %v105_v12  ;;  %174 = vmatpush.msra.mxu1 %v160_v27  ;;  %v148_v44 = vld [vmem:[%s752_s3 + $0x70] sm:$0xff]  ;;  %v149_v45 = vld [vmem:[%s752_s3 + $0x78] sm:$0xff]  ;;  %v146_v48 = vld [vmem:[%s752_s3 + $0x60] sm:$0xff] }
   0xe   :  { %197 = vmatpush.msra.mxu2 %v161_v28  ;;  %v147_v49 = vld [vmem:[%s752_s3 + $0x68] sm:$0xff]  ;;  %v144_v51 = vld [vmem:[%s752_s3 + $0x50] sm:$0xff]  ;;  %v145_v52 = vld [vmem:[%s752_s3 + $0x58] sm:$0xff] }
   0xf   :  { %117 = vmatpush.msra.mxu0 %v104_v13  ;;  %175 = vmatpush.msra.mxu1 %v158_v29  ;;  %v142_v55 = vld [vmem:[%s752_s3 + $0x40] sm:$0xff]  ;;  %v143_v56 = vld [vmem:[%s752_s3 + $0x48] sm:$0xff]  ;;  %v140_v58 = vld [vmem:[%s752_s3 + $0x30] sm:$0xff] }
  0x10   :  { %198 = vmatpush.msra.mxu2 %v159_v30  ;;  %v141_v59 = vld [vmem:[%s752_s3 + $0x38] sm:$0xff]  ;;  %v138_v62 = vld [vmem:[%s752_s3 + $0x20] sm:$0xff]  ;;  %v139_v63 = vld [vmem:[%s752_s3 + $0x28] sm:$0xff] }
  0x11   :  { %118 = vmatpush.msra.mxu0 %v103_v14  ;;  %176 = vmatpush.msra.mxu1 %v156_v31  ;;  %v136_v0 = vld [vmem:[%s752_s3 + $0x10] sm:$0xff]  ;;  %v137_v1 = vld [vmem:[%s752_s3 + $0x18] sm:$0xff]  ;;  %v134_v2 = vld [vmem:[%s752_s3] sm:$0xff] }
  0x12   :  { %199 = vmatpush.msra.mxu2 %v157_v32  ;;  %v135_v3 = vld [vmem:[%s752_s3 + $0x8] sm:$0xff]  ;;  %v248_v4 = vld [vmem:[%s753_s5 + $0x78] sm:$0xff]  ;;  %v247_v6 = vld [vmem:[%s753_s5 + $0x70] sm:$0xff] }
  0x13   :  { %119 = vmatpush.msra.mxu0 %v102_v15  ;;  %177 = vmatpush.msra.mxu1 %v154_v34  ;;  %v264_v5 = vld [vmem:[%s753_s5 + $0xf8] sm:$0xff]  ;;  %v263_v7 = vld [vmem:[%s753_s5 + $0xf0] sm:$0xff]  ;;  %v246_v8 = vld [vmem:[%s753_s5 + $0x68] sm:$0xff] }
  0x14   :  { %200 = vmatpush.msra.mxu2 %v155_v35  ;;  %269 = vmatpush.msra.mxu3 %v248_v4  ;;  %v262_v9 = vld [vmem:[%s753_s5 + $0xe8] sm:$0xff]  ;;  %v245_v10 = vld [vmem:[%s753_s5 + $0x60] sm:$0xff]  ;;  %v244_v12 = vld [vmem:[%s753_s5 + $0x58] sm:$0xff] }
  0x15   :  { %120 = vmatpush.msra.mxu0 %v101_v16  ;;  %178 = vmatpush.msra.mxu1 %v152_v37  ;;  %v261_v11 = vld [vmem:[%s753_s5 + $0xe0] sm:$0xff]  ;;  %v260_v13 = vld [vmem:[%s753_s5 + $0xd8] sm:$0xff]  ;;  %v243_v14 = vld [vmem:[%s753_s5 + $0x50] sm:$0xff] }
  0x16   :  { %201 = vmatpush.msra.mxu2 %v153_v38  ;;  %270 = vmatpush.msra.mxu3 %v247_v6  ;;  %v259_v15 = vld [vmem:[%s753_s5 + $0xd0] sm:$0xff]  ;;  %v242_v16 = vld [vmem:[%s753_s5 + $0x48] sm:$0xff]  ;;  %v237_v28 = vld [vmem:[%s753_s5 + $0x20] sm:$0xff] }
  0x17   :  { %121 = vmatpush.msra.mxu0 %v100_v17  ;;  %179 = vmatpush.msra.mxu1 %v150_v42  ;;  %v258_v17 = vld [vmem:[%s753_s5 + $0xc8] sm:$0xff]  ;;  %v255_v23 = vld [vmem:[%s753_s5 + $0xb0] sm:$0xff]  ;;  %v253_v29 = vld [vmem:[%s753_s5 + $0xa0] sm:$0xff] }
  0x18   :  { %202 = vmatpush.msra.mxu2 %v151_v43  ;;  %271 = vmatpush.msra.mxu3 %v246_v8  ;;  %v238_v24 = vld [vmem:[%s753_s5 + $0x28] sm:$0xff]  ;;  %v236_v30 = vld [vmem:[%s753_s5 + $0x18] sm:$0xff]  ;;  %v235_v32 = vld [vmem:[%s753_s5 + $0x10] sm:$0xff] }
  0x19   :  { %122 = vmatpush.msra.mxu0 %v99_v18  ;;  %180 = vmatpush.msra.mxu1 %v148_v44  ;;  %v241_v18 = vld [vmem:[%s753_s5 + $0x40] sm:$0xff]  ;;  %v254_v27 = vld [vmem:[%s753_s5 + $0xa8] sm:$0xff]  ;;  %v252_v31 = vld [vmem:[%s753_s5 + $0x98] sm:$0xff] }
  0x1a   :  { %203 = vmatpush.msra.mxu2 %v149_v45  ;;  %272 = vmatpush.msra.mxu3 %v245_v10  ;;  %v251_v33 = vld [vmem:[%s753_s5 + $0x90] sm:$0xff]  ;;  %v234_v34 = vld [vmem:[%s753_s5 + $0x8] sm:$0xff]  ;;  %v233_v36 = vld [vmem:[%s753_s5] sm:$0xff] }
  0x1b   :  { %123 = vmatpush.msra.mxu0 %v98_v19  ;;  %181 = vmatpush.msra.mxu1 %v146_v48  ;;  %v257_v19 = vld [vmem:[%s753_s5 + $0xc0] sm:$0xff]  ;;  %v250_v35 = vld [vmem:[%s753_s5 + $0x88] sm:$0xff] }
  0x1c   :  { %204 = vmatpush.msra.mxu2 %v147_v49  ;;  %273 = vmatpush.msra.mxu3 %v244_v12  ;;  %v249_v37 = vld [vmem:[%s753_s5 + $0x80] sm:$0xff] }
  0x1d   :  { %124 = vmatpush.msra.mxu0 %v97_v20  ;;  %182 = vmatpush.msra.mxu1 %v144_v51  ;;  %v240_v20 = vld [vmem:[%s753_s5 + $0x38] sm:$0xff]  ;;  %v166_v38 = vld [vmem:[%s754_s4] sm:$0x3] }
  0x1e   :  { %205 = vmatpush.msra.mxu2 %v145_v52  ;;  %274 = vmatpush.msra.mxu3 %v243_v14  ;;  %v169_v42 = vperm.slane %v166_v38, 1  ;;  %v398_v54 = vld [vmem:[%s755_s6] ss:$0 sm:$0xff] }
  0x1f   :  { %125 = vmatpush.msra.mxu0 %v96_v21  ;;  %183 = vmatpush.msra.mxu1 %v142_v55  ;;  %v256_v21 = vld [vmem:[%s753_s5 + $0xb8] sm:$0xff] }
  0x20   :  { %206 = vmatpush.msra.mxu2 %v143_v56  ;;  %275 = vmatpush.msra.mxu3 %v242_v16 }
  0x21   :  { %126 = vmatpush.msra.mxu0 %v95_v22  ;;  %184 = vmatpush.msra.mxu1 %v140_v58  ;;  %v239_v22 = vld [vmem:[%s753_s5 + $0x30] sm:$0xff] }
  0x22   :  { %207 = vmatpush.msra.mxu2 %v141_v59  ;;  %276 = vmatpush.msra.mxu3 %v241_v18 }
  0x23   :  { %185 = vmatpush.msra.mxu1 %v138_v62  ;;  %292 = vmatpush.msrb.mxu0 %v264_v5 }
  0x24   :  { %208 = vmatpush.msra.mxu2 %v139_v63  ;;  %277 = vmatpush.msra.mxu3 %v240_v20 }
  0x25   :  { %186 = vmatpush.msra.mxu1 %v136_v0  ;;  %293 = vmatpush.msrb.mxu0 %v263_v7 }
  0x26   :  { %209 = vmatpush.msra.mxu2 %v137_v1  ;;  %278 = vmatpush.msra.mxu3 %v239_v22  ;;  %v338_v1 = vld [vmem:[%s756_s7] sm:$0xff] }
  0x27   :  { %187 = vmatpush.msra.mxu1 %v134_v2  ;;  %294 = vmatpush.msrb.mxu0 %v262_v9 }
  0x28   :  { %210 = vmatpush.msra.mxu2 %v135_v3  ;;  %279 = vmatpush.msra.mxu3 %v238_v24  ;;  %v339_v3 = vld [vmem:[%s756_s7 + $0x8] sm:$0xff] }
  0x29   :  { %377 = vmatpush.msrb.mxu1 %v264_v5  ;;  %295 = vmatpush.msrb.mxu0 %v261_v11 }
  0x2a   :  { %280 = vmatpush.msra.mxu3 %v237_v28 }
  0x2b   :  { %378 = vmatpush.msrb.mxu1 %v263_v7  ;;  %296 = vmatpush.msrb.mxu0 %v260_v13 }
  0x2c   :  { %281 = vmatpush.msra.mxu3 %v236_v30 }
  0x2d   :  { %379 = vmatpush.msrb.mxu1 %v262_v9  ;;  %297 = vmatpush.msrb.mxu0 %v259_v15 }
  0x2e   :  { %282 = vmatpush.msra.mxu3 %v235_v32 }
  0x2f   :  { %380 = vmatpush.msrb.mxu1 %v261_v11  ;;  %298 = vmatpush.msrb.mxu0 %v258_v17 }
  0x30   :  { %283 = vmatpush.msra.mxu3 %v234_v34 }
  0x31   :  { %381 = vmatpush.msrb.mxu1 %v260_v13  ;;  %299 = vmatpush.msrb.mxu0 %v257_v19 }
  0x32   :  { %284 = vmatpush.msra.mxu3 %v233_v36 }
  0x33   :  { %382 = vmatpush.msrb.mxu1 %v259_v15  ;;  %300 = vmatpush.msrb.mxu0 %v256_v21 }
  0x35   :  { %383 = vmatpush.msrb.mxu1 %v258_v17  ;;  %301 = vmatpush.msrb.mxu0 %v255_v23 }
  0x37   :  { %384 = vmatpush.msrb.mxu1 %v257_v19  ;;  %302 = vmatpush.msrb.mxu0 %v254_v27  ;;  %v348_v19 = vld [vmem:[%s757_s8] sm:$0xff] }
  0x39   :  { %385 = vmatpush.msrb.mxu1 %v256_v21  ;;  %303 = vmatpush.msrb.mxu0 %v253_v29 }
  0x3b   :  { %386 = vmatpush.msrb.mxu1 %v255_v23  ;;  %304 = vmatpush.msrb.mxu0 %v252_v31 }
  0x3d   :  { %387 = vmatpush.msrb.mxu1 %v254_v27  ;;  %305 = vmatpush.msrb.mxu0 %v251_v33 }
  0x3f   :  { %388 = vmatpush.msrb.mxu1 %v253_v29  ;;  %306 = vmatpush.msrb.mxu0 %v250_v35 }
  0x41   :  { %389 = vmatpush.msrb.mxu1 %v252_v31  ;;  %307 = vmatpush.msrb.mxu0 %v249_v37 }
  0x43   :  { %390 = vmatpush.msrb.mxu1 %v251_v33 }
  0x45   :  { %391 = vmatpush.msrb.mxu1 %v250_v35 }
  0x47   :  { %392 = vmatpush.msrb.mxu1 %v249_v37 }
  0x74   :  { %v65_v39 = vpop.permute.xlu0 %64  ;;  %v68_v40 = vpop.permute.xlu1 %67 }
  0x75   :  { %vm69_vm2 = vcmp.eq.s32.totalorder %v583_v50, %v65_v39  ;;  %vm70_vm5 = vcmp.eq.s32.totalorder %v583_v50, %v68_v40  ;;  %v168_v39 = vperm.slane %v166_v38, 0 }
  0x7c   :  { %v77_v53 = vpop.permute.xlu0 %76  ;;  %v80_v57 = vpop.permute.xlu1 %79 }
  0x7d   :  { %vm81_vm0 = vcmp.eq.s32.totalorder %v583_v50, %v77_v53  ;;  %vm82_vm6 = vcmp.eq.s32.totalorder %v583_v50, %v80_v57 }
  0x7e   :  { %vm83_vm3 = vmor %vm69_vm2, %vm81_vm0 }
  0x7f   :  { %vm89_vm4 = vmor %vm83_vm3, %vm87_vm1 }
  0x80   :  { %375 = vmatmul.msk.f32.vlgmr.msra.gmra.mxu0 %vm89_vm4, %v412_v60  ;;  %vm84_vm7 = vmor %vm70_vm5, %vm82_vm6 }
  0x81   :  { %vm90_vm9 = vmor %vm84_vm7, %vm88_vm8 }
  0x88   :  { %376 = vmatmul.msk.f32.gmra.mxu0 %vm90_vm9, %v412_v60 }
  0xfd   :  { %v128_v25 = vpop.f32.mrf.mxu0 }
  0xfe   :  { %188 = vmatmul.f32.vlgmr.msra.gmra.mxu1 %v128_v25  ;;  %211 = vmatmul.f32.vlgmr.msra.gmra.mxu2 %v128_v25 }
 0x105   :  { %v131_v26 = vpop.f32.mrf.mxu0 }
 0x106   :  { %191 = vmatmul.f32.gmra.mxu1 %v131_v26  ;;  %214 = vmatmul.f32.gmra.mxu2 %v131_v26  ;;  %v349_v26 = vld [vmem:[%s757_s8 + $0x8] sm:$0xff] }
 0x17b   :  { %v189_v40 = vpop.f32.mrf.mxu1 }
 0x17c   :  { %v190_v41 = vadd.f32 %v189_v40, %v168_v39 }
 0x17e   :  { %399 = vtanh.f32 %v190_v41 }
 0x181   :  { %v212_v43 = vpop.f32.mrf.mxu2 }
 0x182   :  { %v213_v44 = vadd.f32 %v212_v43, %v169_v42 }
 0x183   :  { %v192_v45 = vpop.f32.mrf.mxu1 }
 0x184   :  { %v400_v46 = vpop.eup %399  ;;  %v226_v47 = vmax.f32 %v213_v44, 0.0  ;;  %v193_v48 = vadd.f32 %v192_v45, %v168_v39 }
 0x185   :  { %285 = vmatmul.f32.vlgmr.msra.gmra.mxu3 %v400_v46 }
 0x186   :  { %401 = vtanh.f32 %v193_v48  ;;  %308 = vmatmul.f32.vlgmr.msrb.gmra.mxu0 %v226_v47 }
 0x189   :  { %v215_v49 = vpop.f32.mrf.mxu2 }
 0x18a   :  { %v216_v51 = vadd.f32 %v215_v49, %v169_v42 }
 0x18c   :  { %v402_v52 = vpop.eup %401  ;;  %v228_v53 = vmax.f32 %v216_v51, 0.0 }
 0x18d   :  { %288 = vmatmul.f32.gmra.mxu3 %v402_v52 }
 0x18e   :  { %311 = vmatmul.f32.vlgmr.msrb.gmra.mxu1 %v228_v53 }
 0x203   :  { %v309_v57 = vpop.f32.mrf.mxu0 }
 0x208   :  { %v286_v55 = vpop.f32.mrf.mxu3 }
 0x209   :  { %v287_v56 = vadd.f32 %v398_v54, %v286_v55 }
 0x20b   :  { %v310_v58 = vadd.f32 %v309_v57, %v287_v56  ;;  %v312_v62 = vpop.f32.mrf.mxu1 }
 0x20d   :  { %v316_v59 = vsel %vm315_vm10, %v310_v58, -1e+30  ;;  %v340_v2 = vmul.f32 %v338_v1, %v310_v58 }
 0x20e   :  { %318 = vmax.xlane.f32.xlu2 %v316_v59 }
 0x210   :  { %v289_v60 = vpop.f32.mrf.mxu3 }
 0x211   :  { %v290_v61 = vadd.f32 %v398_v54, %v289_v60 }
 0x213   :  { %v313_v63 = vadd.f32 %v312_v62, %v290_v61 }
 0x215   :  { %v317_v0 = vsel %vm315_vm10, %v313_v63, -1e+30  ;;  %v341_v4 = vmul.f32 %v339_v3, %v313_v63 }
 0x216   :  { %320 = vmax.xlane.f32.xlu2 %v317_v0 }
 0x21e   :  { %342 = vadd.xlane.f32.xlu2 %v340_v2 }
 0x226   :  { %344 = vadd.xlane.f32.xlu2 %v341_v4 }
 0x281   :  { %v319_v5 = vpop.xlane.xlu2 %318 }
 0x282   :  { %v322_v6 = vsub.f32 %v316_v59, %v319_v5 }
 0x284   :  { %v324_v7 = vmul.f32 1.442695, %v322_v6 }
 0x286   :  { %403 = vpow2.f32 %v324_v7 }
 0x289   :  { %v321_v8 = vpop.xlane.xlu2 %320 }
 0x28a   :  { %v323_v9 = vsub.f32 %v317_v0, %v321_v8 }
 0x28c   :  { %v404_v10 = vpop.eup %403  ;;  %v326_v11 = vmul.f32 1.442695, %v323_v9 }
 0x28d   :  { %328 = vadd.xlane.f32.xlu0 %v404_v10 }
 0x28e   :  { %405 = vpow2.f32 %v326_v11 }
 0x291   :  { %v343_v17 = vpop.xlane.xlu2 %342 }
 0x294   :  { %v406_v12 = vpop.eup %405 }
 0x295   :  { %330 = vadd.xlane.f32.xlu1 %v406_v12 }
 0x299   :  { %v345_v25 = vpop.xlane.xlu2 %344 }
 0x300   :  { %v329_v13 = vpop.xlane.xlu0 %328 }
 0x301   :  { %407 = vlog2.f32 %v329_v13 }
 0x307   :  { %v408_v14 = vpop.eup %407 }
 0x308   :  { %v333_v15 = vmul.f32 0.6931472, %v408_v14  ;;  %v331_v16 = vpop.xlane.xlu1 %330 }
 0x309   :  { %409 = vlog2.f32 %v331_v16 }
 0x30a   :  { %v336_v18 = vadd.f32 %v333_v15, %v319_v5 }
 0x30c   :  { %v346_v20 = vsub.f32 %v336_v18, %v343_v17 }
 0x30e   :  { %v350_v21 = vmul.f32 %v348_v19, %v346_v20 }
 0x30f   :  { %v410_v22 = vpop.eup %409 }
 0x310   :  { %v335_v23 = vmul.f32 0.6931472, %v410_v22  ;;  %355 = vperm.xlu2 %397, %v350_v21  }
 0x312   :  { %v337_v24 = vadd.f32 %v335_v23, %v321_v8 }
 0x314   :  { %v347_v27 = vsub.f32 %v337_v24, %v345_v25 }
 0x316   :  { %v351_v28 = vmul.f32 %v349_v26, %v347_v27 }
 0x318   :  { %360 = vperm.xlu2 %397, %v351_v28  }
 0x36a   :  { %v356_v29 = vpop.permute.xlu2 %355 }
 0x36b   :  { %v363_v30 = vsel %vm352_vm11, %v356_v29, 0.0 }
 0x36c   :  { %v365_v31 = vadd.f32 %v363_v30, %v310_v58 }
 0x36e   :  { %367 = vst [vmem:[%s758_s9] sm:$0xff] %v365_v31 }
 0x372   :  { %v361_v32 = vpop.permute.xlu2 %360 }
 0x373   :  { %v364_v33 = vsel %vm352_vm11, %v361_v32, 0.0 }
 0x374   :  { %v366_v34 = vadd.f32 %v364_v33, %v313_v63 }
 0x376   :  { %368 = vst [vmem:[%s758_s9 + $0x8] sm:$0xff] %v366_v34 }

</bundles_post_ra>
